<compile_context>
chip_gen: v5e
topology: v5e:2x2
jax: 0.10.0
libtpu: 0.0.40
codegen_flags: <defaults>
</compile_context>

<pallas_src>
import functools

import jax
import jax.numpy as jnp
from jax.experimental import pallas as pl
from jax.experimental.pallas import tpu as pltpu


def _cdiv(a: int, b: int) -> int:
    return -(-a // b)


def _round_up(n: int, m: int) -> int:
    return _cdiv(n, m) * m


def _replicator_linear_kernel(skip_ref, x_ref, w_ref, b_ref, o_ref):
    """One batch tile of the replicator update.

    skip_ref: (1,)      SMEM scalar prefetch: skip coefficient
    x_ref:    (TB, Dp)  state tile (native dtype, fed straight to the MXU)
    w_ref:    (Dp, Dp)  fitness weight, pre-transposed (D_in, D_out), resident
    b_ref:    (1, Dp)   fitness bias, resident
    o_ref:    (TB, Dp)  dx/dt output tile
    """
    x = x_ref[...]
    # fitness f(x) = x @ W^T + b  -> MXU with f32 accumulation
    f = jnp.dot(x, w_ref[...], preferred_element_type=jnp.float32)
    f = f + b_ref[...].astype(jnp.float32)

    # elementwise / reduction tail in f32 (safe on v5e's f32-only VPU)
    xf = x.astype(jnp.float32)
    p = xf * f                                       # reused for phi and output
    phi = jnp.sum(p, axis=-1, keepdims=True)         # (TB, 1), XLU reduction

    skip = skip_ref[0]
    # x*(f - phi) + skip*x  ==  p - x*(phi - skip)
    o_ref[...] = (p - xf * (phi - skip)).astype(o_ref.dtype)


def replicator_linear_forward(t, x, w_t, bias, skip, *, tile_b=512,
                              use_bf16_matmul=False):
    """Pallas wrapper.

    `t` is accepted for ODE-solver API parity but unused (the linear fitness
    function is time-independent).

    x:    (B, D)   state
    w_t:  (D, D)   linear weight stored pre-transposed (D_in, D_out), i.e.
                   fitness = x @ w_t + bias == PyTorch x @ W.T + b
    bias: (D,)
    skip: scalar   skip coefficient (0.0 when learnable_skip=False)
    use_bf16_matmul: cast f32 x/W to bf16 MXU operands (looser numerics).
    """
    del t
    B, D = x.shape
    orig_dtype = x.dtype

    if use_bf16_matmul and x.dtype == jnp.float32:
        x = x.astype(jnp.bfloat16)
        w_t = w_t.astype(jnp.bfloat16)

    # Feature axis: only pad when D > 128 and not already a multiple of 128.
    # For D <= 128 the block's last dim equals the full array dim (allowed by
    # the (8,128) rule) and masked stores beat 4x padded DMA traffic.
    if D % 128 == 0 or D <= 128:
        Dp = D
    else:
        Dp = _round_up(D, 128)
    if Dp != D:
        # Zero padding keeps the math exact: padded x cols contribute 0 to
        # phi, padded W rows/cols and bias entries give zero fitness cols, and
        # the padded output cols are sliced off below.
        x = jnp.pad(x, ((0, 0), (0, Dp - D)))
        w_t = jnp.pad(w_t, ((0, Dp - D), (0, Dp - D)))
        bias = jnp.pad(bias, (0, Dp - D))
    b2 = bias.reshape(1, Dp)
    skip_arr = jnp.asarray(skip, jnp.float32).reshape(1)

    # ---- VMEM budget & batch tile selection --------------------------------
    x_isz = x.dtype.itemsize
    o_isz = jnp.dtype(orig_dtype).itemsize
    w_isz = w_t.dtype.itemsize

    try:
        vmem_cap = int(pltpu.get_tpu_info().vmem_capacity_bytes)
    except Exception:  # conservative fallback if the query is unavailable
        vmem_cap = 128 * 1024 * 1024
    vmem_budget = int(0.75 * vmem_cap)   # leave headroom for Mosaic scratch

    resident = 2 * (Dp * Dp * w_isz + Dp * 4)   # W + bias (double-buffered)
    per_row = 2 * Dp * (x_isz + o_isz)          # double-buffered x + out rows

    if B <= 8:
        tb = B                                   # single block == full batch
    else:
        # Balanced tiles (near-equal, multiple of 8) with enough grid steps
        # to feed both v7x TensorCores / keep the DMA pipeline overlapped.
        nsteps = max(_cdiv(B, tile_b), min(4, _cdiv(B, 8)))
        tb = _round_up(_cdiv(B, nsteps), 8)
        avail = vmem_budget - resident
        if avail > 0:
            max_rows = max(8, (avail // per_row) // 8 * 8)
            tb = min(tb, max_rows)
        else:
            tb = 8  # TODO(synk): needs the K-tiled variant; W alone > budget

    grid_b = _cdiv(B, tb)
    needed = 2 * tb * Dp * (x_isz + o_isz) + resident
    vmem_bytes = int(min(vmem_budget, max(32 * 1024 * 1024, 2 * needed)))

    out = pl.pallas_call(
        _replicator_linear_kernel,
        out_shape=jax.ShapeDtypeStruct((B, Dp), orig_dtype),
        grid_spec=pltpu.PrefetchScalarGridSpec(
            num_scalar_prefetch=1,               # skip coefficient -> SMEM
            grid=(grid_b,),
            in_specs=[
                pl.BlockSpec((tb, Dp), lambda i, s: (i, 0)),   # x tile
                pl.BlockSpec((Dp, Dp), lambda i, s: (0, 0)),   # W^T (resident)
                pl.BlockSpec((1, Dp), lambda i, s: (0, 0)),    # bias (resident)
            ],
            out_specs=pl.BlockSpec((tb, Dp), lambda i, s: (i, 0)),
        ),
        compiler_params=pltpu.CompilerParams(
            dimension_semantics=("parallel",),   # batch axis -> both TCs on v7x
            vmem_limit_bytes=vmem_bytes,
        ),
    )(skip_arr, x, w_t, b2)

    if Dp != D:
        out = out[:, :D]
    return out


def replicator_linear_reference(t, x, w_t, bias, skip):
    """Pure-JAX reference for the correctness check."""
    del t
    f = jnp.dot(x, w_t, precision=jax.lax.Precision.HIGHEST) + bias[None, :]
    phi = jnp.sum(x * f, axis=-1, keepdims=True)
    return x * (f - phi) + skip * x


if __name__ == "__main__":
    key = jax.random.PRNGKey(0)

    learnable_skip = True
    skip = jnp.float32(1.0) if learnable_skip else jnp.float32(0.0)
    t = jnp.float32(0.0)

    fwd = jax.jit(functools.partial(replicator_linear_forward, tile_b=512))

    # Cases: small single tile; ragged multi-tile batch; D > 128 that is not a
    # multiple of 128 (exercises the lane-dense feature-padding path).
    cases = [(8, 32), (52, 32), (40, 200)]
    for B, D in cases:
        key, k_x, k_w, k_b = jax.random.split(key, 4)
        # Deterministic init (mimics nn.Linear default scale 1/sqrt(D)).
        w = jax.random.uniform(k_w, (D, D), jnp.float32, -1.0, 1.0) / jnp.sqrt(D)
        w_t = w.T                 # stored pre-transposed: fitness = x @ w_t + b
        bias = jax.random.uniform(k_b, (D,), jnp.float32, -1.0, 1.0) / jnp.sqrt(D)
        # Input state: rows on the probability simplex (typical replicator state).
        x_raw = jax.random.uniform(k_x, (B, D), jnp.float32, 0.1, 1.0)
        x = x_raw / jnp.sum(x_raw, axis=-1, keepdims=True)

        out = jax.block_until_ready(fwd(t, x, w_t, bias, skip))
        ref = replicator_linear_reference(t, x, w_t, bias, skip)
        assert out.shape == (B, D)
        assert jnp.allclose(out, ref, atol=2e-5, rtol=1e-4), (
            f"mismatch vs reference for B={B}, D={D}")

    print("KERNEL_OK")
</pallas_src>

<mosaic_0001>
module attributes {stable_mosaic.version = 11 : i64} {
  func.func @_replicator_linear_kernel(%arg0: i32, %arg1: memref<1xf32, #tpu.memory_space<smem>>, %arg2: memref<8x32xf32, #tpu.memory_space<vmem>>, %arg3: memref<32x32xf32, #tpu.memory_space<vmem>>, %arg4: memref<1x32xf32, #tpu.memory_space<vmem>>, %arg5: memref<8x32xf32, #tpu.memory_space<vmem>>) attributes {dimension_semantics = [#tpu.dimension_semantics<parallel>], iteration_bounds = array<i64: 1>, scalar_prefetch = 1 : i64, scratch_operands = 0 : i64, tpu.core_type = #tpu.core_type<tc>, window_params = [{transform_indices = @transform_0, window_bounds = array<i64: 8, 32>}, {pipeline_mode = #tpu.pipeline_mode<synchronous>, transform_indices = @transform_1, window_bounds = array<i64: 32, 32>}, {pipeline_mode = #tpu.pipeline_mode<synchronous>, transform_indices = @transform_2, window_bounds = array<i64: 1, 32>}, {transform_indices = @transform_3, window_bounds = array<i64: 8, 32>}]} {
    %c0 = arith.constant 0 : index
    %c0_0 = arith.constant 0 : index
    %0 = vector.load %arg2[%c0, %c0_0] : memref<8x32xf32, #tpu.memory_space<vmem>>, vector<8x32xf32>
    %c0_1 = arith.constant 0 : index
    %c0_2 = arith.constant 0 : index
    %1 = vector.load %arg3[%c0_1, %c0_2] : memref<32x32xf32, #tpu.memory_space<vmem>>, vector<32x32xf32>
    %cst = arith.constant dense<0.000000e+00> : vector<8x32xf32>
    %2 = tpu.matmul %0, %1, %cst {dimension_numbers = #tpu.dot_dimension_numbers<[1], [0], [0], [1], [0, 0, 1, 1], [], []>} : vector<8x32xf32>, vector<32x32xf32>, vector<8x32xf32> -> vector<8x32xf32>
    %c0_3 = arith.constant 0 : index
    %c0_4 = arith.constant 0 : index
    %3 = vector.load %arg4[%c0_3, %c0_4] : memref<1x32xf32, #tpu.memory_space<vmem>>, vector<1x32xf32>
    %4 = vector.broadcast %3 : vector<1x32xf32> to vector<8x32xf32>
    %5 = arith.addf %2, %4 : vector<8x32xf32>
    %6 = arith.mulf %0, %5 : vector<8x32xf32>
    %cst_5 = arith.constant dense<0.000000e+00> : vector<8xf32>
    %7 = vector.multi_reduction <add>, %6, %cst_5 [1] : vector<8x32xf32> to vector<8xf32>
    %8 = vector.shape_cast %7 : vector<8xf32> to vector<8x1xf32>
    %c0_6 = arith.constant 0 : index
    %9 = memref.load %arg1[%c0_6] : memref<1xf32, #tpu.memory_space<smem>>
    %10 = vector.broadcast %9 : f32 to vector<8x1xf32>
    %11 = arith.subf %8, %10 : vector<8x1xf32>
    %12 = vector.broadcast %11 : vector<8x1xf32> to vector<8x32xf32>
    %13 = arith.mulf %0, %12 : vector<8x32xf32>
    %14 = arith.subf %6, %13 : vector<8x32xf32>
    %c0_7 = arith.constant 0 : index
    %c0_8 = arith.constant 0 : index
    %15 = vector.load %arg5[%c0_7, %c0_8] : memref<8x32xf32, #tpu.memory_space<vmem>>, vector<8x32xf32>
    tpu.vector_store %arg5[%c0_7, %c0_8], %14 {strides = array<i32>} : memref<8x32xf32, #tpu.memory_space<vmem>>, vector<8x32xf32>,
    return
  }
  func.func @transform_0(%arg0: i32, %arg1: memref<1xf32, #tpu.memory_space<smem>>) -> (i32, i32) {
    %c0_i32 = arith.constant 0 : i32
    %c0_i32_0 = arith.constant 0 : i32
    return %arg0, %c0_i32 : i32, i32
  }
  func.func @transform_1(%arg0: i32, %arg1: memref<1xf32, #tpu.memory_space<smem>>) -> (i32, i32) {
    %c0_i32 = arith.constant 0 : i32
    %c0_i32_0 = arith.constant 0 : i32
    %c0_i32_1 = arith.constant 0 : i32
    return %c0_i32, %c0_i32_0 : i32, i32
  }
  func.func @transform_2(%arg0: i32, %arg1: memref<1xf32, #tpu.memory_space<smem>>) -> (i32, i32) {
    %c0_i32 = arith.constant 0 : i32
    %c0_i32_0 = arith.constant 0 : i32
    %c0_i32_1 = arith.constant 0 : i32
    return %c0_i32, %c0_i32_0 : i32, i32
  }
  func.func @transform_3(%arg0: i32, %arg1: memref<1xf32, #tpu.memory_space<smem>>) -> (i32, i32) {
    %c0_i32 = arith.constant 0 : i32
    %c0_i32_0 = arith.constant 0 : i32
    return %arg0, %c0_i32 : i32, i32
  }
}

</mosaic_0001>

<bundles_post_ra>
// kernel: replicator_linear_forward.1
= control target key start
LH: loop header
LB: loop body
LE: loop exit
PB: predicated region body
PF: predicated region fallthrough
CT: control target
= control target key end

     0   :  { %10 = vsyncpa [#allocation5], 0  ;;  %s241_s0 = inlined_call_operand.<no memory space> [shape: f32[1], index: 0, kind: input, shape index: {}]   ;;  %s242_s1 = inlined_call_operand.hbm [shape: f32[8,32], index: 1, kind: input, shape index: {}]   ;;  %s243_s2 = inlined_call_operand.hbm [shape: f32[32,32], index: 2, kind: input, shape index: {}]   ;;  %s244_s3 = inlined_call_operand.vmem [shape: f32[1,32], index: 3, kind: input, shape index: {}]   ;;  %s245_s4 = inlined_call_operand.hbm [shape: f32[8,32], index: 4, kind: output, shape index: {}]  }
   0x1   :  { %11 = vsyncpa [#allocation8], 0 }
   0x2   :  { %12 = vsyncpa [#allocation6], 0  ;;  %s18_s17 = sshll.u32 %s242_s1, 4  ;;  %s193_s18 = smov [#allocation4]   ;;  %s19_s17 = int_to_ptr.hbm [resolvable:$true] %s18_s17 }
   0x3   :  { %s20_s19 = sshll.u32 %s193_s18, 4  ;;  %s28_s22 = sshll.u32 %s243_s2, 4  ;;  %s21_s19 = int_to_ptr.vmem [resolvable:$true] %s20_s19  ;;  %s29_s22 = int_to_ptr.hbm [resolvable:$true] %s28_s22 }
   0x4   :  { %23 = dma.hbm_to_vmem [thread:$0]  %s19_s17, 128, %s21_s19, [#allocation5]  }
   0x5   :  { %s194_s23 = smov [#allocation7]   ;;  %s195_s25 = smov 128  }
   0x6   :  { %s30_s24 = sshll.u32 %s194_s23, 4  ;;  %s196_s26 = smov 8   ;;  %s31_s24 = int_to_ptr.vmem [resolvable:$true] %s30_s24 }
   0x7   :  { %36 = dma.hbm_to_vmem [thread:$0]  %s29_s22, 512, %s31_s24, [#allocation8], %s195_s25, %s195_s25, %s196_s26  }
   0x8   :  { %187 = dma.done.wait [#allocation5], 128  }
   0x9   :  { %188 = vsyncadd [#allocation5], 4294967168 }
   0xa   :  { %189 = dma.done.wait [#allocation8], 512  }
   0xb   :  { %190 = vsyncadd [#allocation8], 4294966784  ;;  %v51_v0 = vld [vmem:[#allocation7 + $0x18] sm:$0xff]  ;;  %v50_v1 = vld [vmem:[#allocation7 + $0x10] sm:$0xff]  ;;  %vm56_vm0 = vcmask 261120   ;;  %v85_v10 = vstv %s241_s0  ;;  %s197_s29 = smov [#allocation9]  }
   0xc   :  { %72 = vmatpush.msra.mxu0 %v51_v0  ;;  %v49_v2 = vld [vmem:[#allocation7 + $0x8] sm:$0xff]  ;;  %v48_v3 = vld [vmem:[#allocation7] sm:$0xff]  ;;  %v47_v4 = vld [vmem:[#allocation4] sm:$0xff]  ;;  %s95_s30 = sshll.u32 %s197_s29, 4  ;;  %s97_s7 = sshll.u32 %s245_s4, 4  ;;  %s96_s30 = int_to_ptr.vmem [resolvable:$true] %s95_s30  ;;  %s98_s7 = int_to_ptr.hbm [resolvable:$true] %s97_s7 }
   0xd   :  { %v114_v5 = vld [vmem:[%s244_s3] ss:$0 sm:$0xff] }
   0xe   :  { %73 = vmatpush.msra.mxu0 %v50_v1 }
  0x10   :  { %74 = vmatpush.msra.mxu0 %v49_v2 }
  0x12   :  { %75 = vmatpush.msra.mxu0 %v48_v3 }
  0x13   :  { %108 = vmatmul.msk.f32.vlgmr.msra.gmra.mxu0 %vm56_vm0, %v47_v4 }
  0x90   :  { %v77_v6 = vpop.f32.mrf.mxu0 }
  0x91   :  { %v78_v7 = vadd.f32 %v114_v5, %v77_v6 }
  0x93   :  { %v80_v8 = vmul.f32 %v78_v7, %v47_v4 }
  0x95   :  { %v81_v9 = vsel %vm56_vm0, %v80_v8, 0.0 }
  0x96   :  { %82 = vadd.xlane.f32.xlu0 %v81_v9 }
 0x109   :  { %v83_v11 = vpop.xlane.xlu0 %82 }
 0x10a   :  { %v86_v12 = vsub.f32 %v83_v11, %v85_v10 }
 0x10c   :  { %v87_v13 = vmul.f32 %v86_v12, %v47_v4 }
 0x10e   :  { %v88_v14 = vsub.f32 %v80_v8, %v87_v13 }
 0x110   :  { %89 = vst.msk [vmem:[#allocation9] sm:$0xff] %vm56_vm0, %v88_v14 }
 0x111   :  { %100 = dma.vmem_to_hbm [thread:$0]  %s96_s30, 128, %s98_s7, [#allocation6]  }
 0x112   :  { %191 = dma.done.wait [#allocation6], 128  }
 0x113   :  { %192 = vsyncadd [#allocation6], 4294967168 }
 0x114   :  { %105 = vsyncpa [#allocation5], 1 }
 0x115   :  { %106 = vsyncpa [#allocation8], 1 }
 0x116   :  { %107 = vsyncpa [#allocation6], 1 }

</bundles_post_ra>
